<compile_context>
chip_gen: v5e
topology: v5e:2x2
jax: 0.10.0
libtpu: 0.0.40
codegen_flags: <defaults>
</compile_context>

<pallas_src>
import functools

import jax
import jax.numpy as jnp
from jax.experimental import pallas as pl
from jax.experimental.pallas import tpu as pltpu

# Lane-padded layer widths (true widths: 120, 84, output_size<=128).
H1_PAD = 128
H2_PAD = 128
OUT_PAD = 128


def _round_up(x, m):
    return ((x + m - 1) // m) * m


def _choose_tile(batch, block_b):
    """Batch tile: <= block_b rows, multiple of 16, >=2 steps for big batches."""
    block_b = max(16, _round_up(block_b, 16))
    min_steps = 2 if batch > 1024 else 1          # v7x megacore: keep both TCs busy
    steps = max(min_steps, pl.cdiv(batch, block_b))
    return min(block_b, _round_up(pl.cdiv(batch, steps), 16))


def fc_kernel(x_ref, w1_ref, b1_ref, w2_ref, b2_ref, w3_ref, b3_ref, o_ref):
    # x arrives as f32 from HBM; cast to bf16 in-kernel (VPU has slack).
    x = x_ref[...].astype(w1_ref.dtype)
    # fc1 + relu  (bf16 MXU operands, f32 accumulate; bias/ReLU in f32)
    h1 = jnp.dot(x, w1_ref[...], preferred_element_type=jnp.float32)
    h1 = jnp.maximum(h1 + b1_ref[...], 0.0)
    # fc2 + relu
    h2 = jnp.dot(h1.astype(w2_ref.dtype), w2_ref[...],
                 preferred_element_type=jnp.float32)
    h2 = jnp.maximum(h2 + b2_ref[...], 0.0)
    # fc3 (no activation); bf16 only at the final store.
    h3 = jnp.dot(h2.astype(w3_ref.dtype), w3_ref[...],
                 preferred_element_type=jnp.float32)
    o_ref[...] = (h3 + b3_ref[...]).astype(o_ref.dtype)


@functools.partial(jax.jit, static_argnames=("output_size", "block_b"))
def fc_forward(x, params, output_size=10, block_b=4096):
    """x: [B, input_size] float32. params: lane-padded dict (w1,b1,w2,b2,w3,b3)."""
    w1, b1, w2, b2, w3, b3 = (params["w1"], params["b1"], params["w2"],
                              params["b2"], params["w3"], params["b3"])
    B, in_dim = x.shape

    tm = _choose_tile(B, block_b)
    rows = B
    if B < tm:
        # Tiny batch: pad up to one sublane-aligned tile (<=15 extra rows).
        x = jnp.pad(x, ((0, tm - B), (0, 0)))
        rows = tm
    # Ragged larger batches: partial last block (OOB writes dropped), no copy.
    grid = (pl.cdiv(rows, tm),)

    # Advisory cost estimate for the XLA scheduler.
    flops = 2 * rows * (in_dim * H1_PAD + H1_PAD * H2_PAD + H2_PAD * OUT_PAD)
    weight_bytes = sum(int(p.size) * p.dtype.itemsize
                       for p in (w1, b1, w2, b2, w3, b3))
    bytes_accessed = (int(x.size) * x.dtype.itemsize     # f32 x read
                      + rows * OUT_PAD * 2                # bf16 out write
                      + weight_bytes)

    # VMEM budget: double-buffered x/out tiles + resident weights + in-kernel
    # intermediates (h1/h2/h3 f32 + bf16 recasts + bf16 x). Cap for v7x (64 MiB).
    tile_bytes = 2 * tm * in_dim * 4 + 2 * tm * OUT_PAD * 2
    inter_bytes = tm * 128 * (3 * 4 + 2 * 2) + tm * in_dim * 2
    vmem_need = tile_bytes + 2 * weight_bytes + inter_bytes
    vmem_limit = int(min(48 * 1024 * 1024,
                         max(16 * 1024 * 1024, 2 * vmem_need)))

    resident = lambda i: (0, 0)
    out_pad = pl.pallas_call(
        fc_kernel,
        out_shape=jax.ShapeDtypeStruct((rows, OUT_PAD), jnp.bfloat16),
        grid=grid,
        in_specs=[
            pl.BlockSpec((tm, in_dim), lambda i: (i, 0)),   # x: batch-tiled, f32
            pl.BlockSpec(w1.shape, resident),               # weights/biases:
            pl.BlockSpec(b1.shape, resident),               # VMEM-resident
            pl.BlockSpec(w2.shape, resident),
            pl.BlockSpec(b2.shape, resident),
            pl.BlockSpec(w3.shape, resident),
            pl.BlockSpec(b3.shape, resident),
        ],
        out_specs=pl.BlockSpec((tm, OUT_PAD), lambda i: (i, 0)),
        compiler_params=pltpu.CompilerParams(
            dimension_semantics=("parallel",),
            vmem_limit_bytes=vmem_limit),
        cost_estimate=pl.CostEstimate(
            flops=int(flops), transcendentals=0,
            bytes_accessed=int(bytes_accessed)),
    )(x, w1, b1, w2, b2, w3, b3)

    # Slice off batch/lane padding; upcast the small real output to f32.
    return out_pad[:B, :output_size].astype(jnp.float32)


def init_params(key, input_size, output_size=10, compute_dtype=jnp.bfloat16):
    """PyTorch-style init at true sizes, then zero-padded to lane-dense 128."""
    def linear(key, fan_in, fan_out, fan_out_pad):
        kw, kb = jax.random.split(key)
        bound = 1.0 / jnp.sqrt(fan_in)
        # stored as [in, out] (transposed vs torch's [out, in])
        w = jax.random.uniform(kw, (fan_in, fan_out), jnp.float32, -bound, bound)
        b = jax.random.uniform(kb, (1, fan_out), jnp.float32, -bound, bound)
        w = jnp.pad(w, ((0, 0), (0, fan_out_pad - fan_out)))
        b = jnp.pad(b, ((0, 0), (0, fan_out_pad - fan_out)))
        return w, b

    assert output_size <= OUT_PAD
    k1, k2, k3 = jax.random.split(key, 3)
    w1, b1 = linear(k1, input_size, 120, H1_PAD)
    w2, b2 = linear(k2, 120, 84, H2_PAD)
    w3, b3 = linear(k3, 84, output_size, OUT_PAD)
    # Zero-pad the contracting dims of w2/w3 so padded hidden lanes contribute 0.
    w2 = jnp.pad(w2, ((0, H1_PAD - 120), (0, 0)))
    w3 = jnp.pad(w3, ((0, H2_PAD - 84), (0, 0)))
    # Weights in bf16 (MXU operands); biases stay f32 (added to f32 accum).
    return dict(w1=w1.astype(compute_dtype), b1=b1,
                w2=w2.astype(compute_dtype), b2=b2,
                w3=w3.astype(compute_dtype), b3=b3)


def fc_reference(x, p, output_size=10):
    """Pure-JAX reference with the same bf16-operand / f32-accum / bf16-store math."""
    cd = p["w1"].dtype
    h = x.astype(cd)
    h = jnp.maximum(
        jnp.dot(h, p["w1"], preferred_element_type=jnp.float32) + p["b1"], 0.0)
    h = jnp.maximum(
        jnp.dot(h.astype(cd), p["w2"],
                preferred_element_type=jnp.float32) + p["b2"], 0.0)
    h = jnp.dot(h.astype(cd), p["w3"],
                preferred_element_type=jnp.float32) + p["b3"]
    # Match the kernel's bf16 output store precision.
    return h.astype(jnp.bfloat16).astype(jnp.float32)[:, :output_size]


if __name__ == "__main__":
    key = jax.random.PRNGKey(0)
    kx, kx2, kp = jax.random.split(key, 3)

    batch, input_size, output_size = 8, 32, 10
    params = init_params(kp, input_size, output_size)

    # Small batch (tiny-pad path, single grid step).
    x = jax.random.normal(kx, (batch, input_size), dtype=jnp.float32)
    out = jax.block_until_ready(fc_forward(x, params, output_size=output_size))
    ref = fc_reference(x, params, output_size=output_size)
    assert out.shape == (batch, output_size)
    assert jnp.allclose(out, ref, atol=1e-2, rtol=1e-2), (
        float(jnp.max(jnp.abs(out - ref))))

    # Ragged multi-step batch (partial last block, no batch pad copy).
    batch2 = 40
    x2 = jax.random.normal(kx2, (batch2, input_size), dtype=jnp.float32)
    out2 = jax.block_until_ready(
        fc_forward(x2, params, output_size=output_size, block_b=16))
    ref2 = fc_reference(x2, params, output_size=output_size)
    assert out2.shape == (batch2, output_size)
    assert jnp.allclose(out2, ref2, atol=1e-2, rtol=1e-2), (
        float(jnp.max(jnp.abs(out2 - ref2))))

    print("KERNEL_OK")
</pallas_src>

<mosaic_0001>
module attributes {stable_mosaic.version = 11 : i64} {
  func.func @fc_kernel(%arg0: i32, %arg1: memref<16x32xf32, #tpu.memory_space<vmem>>, %arg2: memref<32x128xbf16, #tpu.memory_space<vmem>>, %arg3: memref<1x128xf32, #tpu.memory_space<vmem>>, %arg4: memref<128x128xbf16, #tpu.memory_space<vmem>>, %arg5: memref<1x128xf32, #tpu.memory_space<vmem>>, %arg6: memref<128x128xbf16, #tpu.memory_space<vmem>>, %arg7: memref<1x128xf32, #tpu.memory_space<vmem>>, %arg8: memref<16x128xbf16, #tpu.memory_space<vmem>>) attributes {dimension_semantics = [#tpu.dimension_semantics<parallel>], iteration_bounds = array<i64: 1>, scalar_prefetch = 0 : i64, scratch_operands = 0 : i64, tpu.core_type = #tpu.core_type<tc>, window_params = [{transform_indices = @transform_0, window_bounds = array<i64: 16, 32>}, {pipeline_mode = #tpu.pipeline_mode<synchronous>, transform_indices = @transform_1, window_bounds = array<i64: 32, 128>}, {pipeline_mode = #tpu.pipeline_mode<synchronous>, transform_indices = @transform_2, window_bounds = array<i64: 1, 128>}, {pipeline_mode = #tpu.pipeline_mode<synchronous>, transform_indices = @transform_3, window_bounds = array<i64: 128, 128>}, {pipeline_mode = #tpu.pipeline_mode<synchronous>, transform_indices = @transform_4, window_bounds = array<i64: 1, 128>}, {pipeline_mode = #tpu.pipeline_mode<synchronous>, transform_indices = @transform_5, window_bounds = array<i64: 128, 128>}, {pipeline_mode = #tpu.pipeline_mode<synchronous>, transform_indices = @transform_6, window_bounds = array<i64: 1, 128>}, {transform_indices = @transform_7, window_bounds = array<i64: 16, 128>}]} {
    %c0 = arith.constant 0 : index
    %c0_0 = arith.constant 0 : index
    %0 = vector.load %arg1[%c0, %c0_0] : memref<16x32xf32, #tpu.memory_space<vmem>>, vector<16x32xf32>
    %1 = arith.truncf %0 : vector<16x32xf32> to vector<16x32xbf16>
    %c0_1 = arith.constant 0 : index
    %c0_2 = arith.constant 0 : index
    %2 = vector.load %arg2[%c0_1, %c0_2] : memref<32x128xbf16, #tpu.memory_space<vmem>>, vector<32x128xbf16>
    %cst = arith.constant dense<0.000000e+00> : vector<16x128xf32>
    %3 = tpu.matmul %1, %2, %cst {dimension_numbers = #tpu.dot_dimension_numbers<[1], [0], [0], [1], [0, 0, 1, 1], [], []>} : vector<16x32xbf16>, vector<32x128xbf16>, vector<16x128xf32> -> vector<16x128xf32>
    %c0_3 = arith.constant 0 : index
    %c0_4 = arith.constant 0 : index
    %4 = vector.load %arg3[%c0_3, %c0_4] : memref<1x128xf32, #tpu.memory_space<vmem>>, vector<1x128xf32>
    %5 = vector.broadcast %4 : vector<1x128xf32> to vector<16x128xf32>
    %6 = arith.addf %3, %5 : vector<16x128xf32>
    %cst_5 = arith.constant 0.000000e+00 : f32
    %7 = vector.broadcast %cst_5 : f32 to vector<16x128xf32>
    %8 = arith.maximumf %6, %7 : vector<16x128xf32>
    %9 = arith.truncf %8 : vector<16x128xf32> to vector<16x128xbf16>
    %c0_6 = arith.constant 0 : index
    %c0_7 = arith.constant 0 : index
    %10 = vector.load %arg4[%c0_6, %c0_7] : memref<128x128xbf16, #tpu.memory_space<vmem>>, vector<128x128xbf16>
    %cst_8 = arith.constant dense<0.000000e+00> : vector<16x128xf32>
    %11 = tpu.matmul %9, %10, %cst_8 {dimension_numbers = #tpu.dot_dimension_numbers<[1], [0], [0], [1], [0, 0, 1, 1], [], []>} : vector<16x128xbf16>, vector<128x128xbf16>, vector<16x128xf32> -> vector<16x128xf32>
    %c0_9 = arith.constant 0 : index
    %c0_10 = arith.constant 0 : index
    %12 = vector.load %arg5[%c0_9, %c0_10] : memref<1x128xf32, #tpu.memory_space<vmem>>, vector<1x128xf32>
    %13 = vector.broadcast %12 : vector<1x128xf32> to vector<16x128xf32>
    %14 = arith.addf %11, %13 : vector<16x128xf32>
    %cst_11 = arith.constant 0.000000e+00 : f32
    %15 = vector.broadcast %cst_11 : f32 to vector<16x128xf32>
    %16 = arith.maximumf %14, %15 : vector<16x128xf32>
    %17 = arith.truncf %16 : vector<16x128xf32> to vector<16x128xbf16>
    %c0_12 = arith.constant 0 : index
    %c0_13 = arith.constant 0 : index
    %18 = vector.load %arg6[%c0_12, %c0_13] : memref<128x128xbf16, #tpu.memory_space<vmem>>, vector<128x128xbf16>
    %cst_14 = arith.constant dense<0.000000e+00> : vector<16x128xf32>
    %19 = tpu.matmul %17, %18, %cst_14 {dimension_numbers = #tpu.dot_dimension_numbers<[1], [0], [0], [1], [0, 0, 1, 1], [], []>} : vector<16x128xbf16>, vector<128x128xbf16>, vector<16x128xf32> -> vector<16x128xf32>
    %c0_15 = arith.constant 0 : index
    %c0_16 = arith.constant 0 : index
    %20 = vector.load %arg7[%c0_15, %c0_16] : memref<1x128xf32, #tpu.memory_space<vmem>>, vector<1x128xf32>
    %21 = vector.broadcast %20 : vector<1x128xf32> to vector<16x128xf32>
    %22 = arith.addf %19, %21 : vector<16x128xf32>
    %23 = arith.truncf %22 : vector<16x128xf32> to vector<16x128xbf16>
    %c0_17 = arith.constant 0 : index
    %c0_18 = arith.constant 0 : index
    %24 = vector.load %arg8[%c0_17, %c0_18] : memref<16x128xbf16, #tpu.memory_space<vmem>>, vector<16x128xbf16>
    tpu.vector_store %arg8[%c0_17, %c0_18], %23 {strides = array<i32>} : memref<16x128xbf16, #tpu.memory_space<vmem>>, vector<16x128xbf16>,
    return
  }
  func.func @transform_0(%arg0: i32) -> (i32, i32) {
    %c0_i32 = arith.constant 0 : i32
    %c0_i32_0 = arith.constant 0 : i32
    return %arg0, %c0_i32 : i32, i32
  }
  func.func @transform_1(%arg0: i32) -> (i32, i32) {
    %c0_i32 = arith.constant 0 : i32
    %c0_i32_0 = arith.constant 0 : i32
    %c0_i32_1 = arith.constant 0 : i32
    return %c0_i32, %c0_i32_0 : i32, i32
  }
  func.func @transform_2(%arg0: i32) -> (i32, i32) {
    %c0_i32 = arith.constant 0 : i32
    %c0_i32_0 = arith.constant 0 : i32
    %c0_i32_1 = arith.constant 0 : i32
    return %c0_i32, %c0_i32_0 : i32, i32
  }
  func.func @transform_3(%arg0: i32) -> (i32, i32) {
    %c0_i32 = arith.constant 0 : i32
    %c0_i32_0 = arith.constant 0 : i32
    %c0_i32_1 = arith.constant 0 : i32
    return %c0_i32, %c0_i32_0 : i32, i32
  }
  func.func @transform_4(%arg0: i32) -> (i32, i32) {
    %c0_i32 = arith.constant 0 : i32
    %c0_i32_0 = arith.constant 0 : i32
    %c0_i32_1 = arith.constant 0 : i32
    return %c0_i32, %c0_i32_0 : i32, i32
  }
  func.func @transform_5(%arg0: i32) -> (i32, i32) {
    %c0_i32 = arith.constant 0 : i32
    %c0_i32_0 = arith.constant 0 : i32
    %c0_i32_1 = arith.constant 0 : i32
    return %c0_i32, %c0_i32_0 : i32, i32
  }
  func.func @transform_6(%arg0: i32) -> (i32, i32) {
    %c0_i32 = arith.constant 0 : i32
    %c0_i32_0 = arith.constant 0 : i32
    %c0_i32_1 = arith.constant 0 : i32
    return %c0_i32, %c0_i32_0 : i32, i32
  }
  func.func @transform_7(%arg0: i32) -> (i32, i32) {
    %c0_i32 = arith.constant 0 : i32
    %c0_i32_0 = arith.constant 0 : i32
    return %arg0, %c0_i32 : i32, i32
  }
}

</mosaic_0001>

<bundles_post_ra>
// kernel: fc_forward.1
= control target key start
LH: loop header
LB: loop body
LE: loop exit
PB: predicated region body
PF: predicated region fallthrough
CT: control target
= control target key end

     0   :  { %12 = vsyncpa [#allocation3], 0  ;;  %s509_s0 = inlined_call_operand.vmem [shape: f32[16,32], index: 0, kind: input, shape index: {}]   ;;  %s510_s1 = inlined_call_operand.vmem [shape: bf16[32,128], index: 1, kind: input, shape index: {}]   ;;  %s511_s2 = inlined_call_operand.vmem [shape: f32[1,128], index: 2, kind: input, shape index: {}]   ;;  %s512_s3 = inlined_call_operand.hbm [shape: bf16[128,128], index: 3, kind: input, shape index: {}]   ;;  %s513_s4 = inlined_call_operand.vmem [shape: f32[1,128], index: 4, kind: input, shape index: {}]   ;;  %s514_s5 = inlined_call_operand.hbm [shape: bf16[128,128], index: 5, kind: input, shape index: {}]   ;;  %s515_s6 = inlined_call_operand.vmem [shape: f32[1,128], index: 6, kind: input, shape index: {}]   ;;  %s516_s7 = inlined_call_operand.vmem [shape: bf16[16,128], index: 7, kind: output, shape index: {}]  }
   0x1   :  { %s24_s26 = sshll.u32 %s512_s3, 4  ;;  %s25_s26 = int_to_ptr.hbm [resolvable:$true] %s24_s26 }
   0x2   :  { %13 = vsyncpa [#allocation5], 0  ;;  %s435_s27 = smov [#allocation2]   ;;  %s39_s8 = sshll.u32 %s514_s5, 4  ;;  %s40_s8 = int_to_ptr.hbm [resolvable:$true] %s39_s8 }
   0x3   :  { %s26_s28 = sshll.u32 %s435_s27, 4  ;;  %s436_s9 = smov 64   ;;  %s27_s28 = int_to_ptr.vmem [resolvable:$true] %s26_s28 }
   0x4   :  { %s437_s10 = smov 4   ;;  %s438_s11 = smov [#allocation4]  }
   0x5   :  { %32 = dma.hbm_to_vmem [thread:$0]  %s25_s26, 1024, %s27_s28, [#allocation3], %s436_s9, %s436_s9, %s437_s10  }
   0x6   :  { %s41_s12 = sshll.u32 %s438_s11, 4  ;;  %s42_s12 = int_to_ptr.vmem [resolvable:$true] %s41_s12 }
   0x7   :  { %47 = dma.hbm_to_vmem [thread:$0]  %s40_s8, 1024, %s42_s12, [#allocation5], %s436_s9, %s436_s9, %s437_s10  }
   0x8   :  { %431 = dma.done.wait [#allocation3], 1024  }
   0x9   :  { %432 = vsyncadd [#allocation3], 4294966272 }
   0xa   :  { %433 = dma.done.wait [#allocation5], 1024  }
   0xb   :  { %434 = vsyncadd [#allocation5], 4294966272  ;;  %v354_v0 = vld [vmem:[%s510_s1 + $0x8] sm:$0xff]  ;;  %v353_v1 = vld [vmem:[%s510_s1] sm:$0xff]  ;;  %vm82_vm0 = vcmask 261120  }
   0xc   :  { %v362_v2 = vld [vmem:[#allocation2 + $0x38] sm:$0xff]  ;;  %92 = vmatpush.bf16.msra.mxu0 %v354_v0  ;;  %v59_v3 = vld [vmem:[%s509_s0] sm:$0xff]  ;;  %v60_v4 = vld [vmem:[%s509_s0 + $0x8] sm:$0xff] }
   0xd   :  { %171 = vmatpush.bf16.msra.mxu1 %v362_v2  ;;  %v361_v5 = vld [vmem:[#allocation2 + $0x30] sm:$0xff]  ;;  %v61_v6 = vpack.c.bf16 %v60_v4, %v59_v3  ;;  %v360_v7 = vld [vmem:[#allocation2 + $0x28] sm:$0xff]  ;;  %v359_v8 = vld [vmem:[#allocation2 + $0x20] sm:$0xff] }
   0xe   :  { %v358_v9 = vld [vmem:[#allocation2 + $0x18] sm:$0xff]  ;;  %v357_v10 = vld [vmem:[#allocation2 + $0x10] sm:$0xff]  ;;  %v356_v11 = vld [vmem:[#allocation2 + $0x8] sm:$0xff] }
   0xf   :  { %v355_v12 = vld [vmem:[#allocation2] sm:$0xff]  ;;  %v370_v13 = vld [vmem:[#allocation4 + $0x38] sm:$0xff]  ;;  %v369_v14 = vld [vmem:[#allocation4 + $0x30] sm:$0xff] }
  0x10   :  { %93 = vmatpush.bf16.msra.mxu0 %v353_v1  ;;  %256 = vmatpush.bf16.msra.mxu2 %v370_v13  ;;  %v368_v15 = vld [vmem:[#allocation4 + $0x28] sm:$0xff]  ;;  %v367_v16 = vld [vmem:[#allocation4 + $0x20] sm:$0xff]  ;;  %v366_v25 = vld [vmem:[#allocation4 + $0x18] sm:$0xff] }
  0x11   :  { %172 = vmatpush.bf16.msra.mxu1 %v361_v5  ;;  %v380_v18 = vld [vmem:[%s511_s2] ss:$0 sm:$0xff]  ;;  %v365_v26 = vld [vmem:[#allocation4 + $0x10] sm:$0xff]  ;;  %v364_v27 = vld [vmem:[#allocation4 + $0x8] sm:$0xff] }
  0x12   :  { %v363_v28 = vld [vmem:[#allocation4] sm:$0xff] }
  0x13   :  { %288 = vmatmul.msk.bf16.vlgmr.msra.gmra.mxu0 %vm82_vm0, %v61_v6  ;;  %v381_v30 = vld [vmem:[%s513_s4] ss:$0 sm:$0xff] }
  0x14   :  { %257 = vmatpush.bf16.msra.mxu2 %v369_v14  ;;  %v382_v38 = vld [vmem:[%s515_s6] ss:$0 sm:$0xff] }
  0x15   :  { %173 = vmatpush.bf16.msra.mxu1 %v360_v7 }
  0x18   :  { %258 = vmatpush.bf16.msra.mxu2 %v368_v15 }
  0x19   :  { %174 = vmatpush.bf16.msra.mxu1 %v359_v8 }
  0x1c   :  { %259 = vmatpush.bf16.msra.mxu2 %v367_v16 }
  0x1d   :  { %175 = vmatpush.bf16.msra.mxu1 %v358_v9 }
  0x20   :  { %260 = vmatpush.bf16.msra.mxu2 %v366_v25 }
  0x21   :  { %176 = vmatpush.bf16.msra.mxu1 %v357_v10 }
  0x24   :  { %261 = vmatpush.bf16.msra.mxu2 %v365_v26 }
  0x25   :  { %177 = vmatpush.bf16.msra.mxu1 %v356_v11 }
  0x28   :  { %262 = vmatpush.bf16.msra.mxu2 %v364_v27 }
  0x29   :  { %178 = vmatpush.bf16.msra.mxu1 %v355_v12 }
  0x2c   :  { %263 = vmatpush.bf16.msra.mxu2 %v363_v28 }
  0x90   :  { %v95_v17 = vpop.f32.mrf.mxu0 }
  0x91   :  { %v96_v19 = vadd.f32 %v380_v18, %v95_v17 }
  0x93   :  { %v100_v22 = vmax.f32 %v96_v19, 0.0 }
  0x98   :  { %v97_v20 = vpop.f32.mrf.mxu0 }
  0x99   :  { %v98_v21 = vadd.f32 %v380_v18, %v97_v20 }
  0x9b   :  { %v101_v23 = vmax.f32 %v98_v21, 0.0 }
  0x9d   :  { %v102_v24 = vpack.c.bf16 %v101_v23, %v100_v22 }
  0x9f   :  { %179 = vmatmul.bf16.vlgmr.msra.gmra.mxu1 %v102_v24 }
 0x11c   :  { %v180_v29 = vpop.f32.mrf.mxu1 }
 0x11d   :  { %v181_v31 = vadd.f32 %v381_v30, %v180_v29 }
 0x11f   :  { %v185_v34 = vmax.f32 %v181_v31, 0.0 }
 0x124   :  { %v182_v32 = vpop.f32.mrf.mxu1 }
 0x125   :  { %v183_v33 = vadd.f32 %v381_v30, %v182_v32 }
 0x127   :  { %v186_v35 = vmax.f32 %v183_v33, 0.0 }
 0x129   :  { %v187_v36 = vpack.c.bf16 %v186_v35, %v185_v34 }
 0x12b   :  { %264 = vmatmul.bf16.vlgmr.msra.gmra.mxu2 %v187_v36 }
 0x1ae   :  { %v265_v37 = vpop.f32.mrf.mxu2 }
 0x1af   :  { %v266_v40 = vadd.f32 %v382_v38, %v265_v37 }
 0x1b6   :  { %v267_v39 = vpop.f32.mrf.mxu2 }
 0x1b7   :  { %v268_v41 = vadd.f32 %v382_v38, %v267_v39 }
 0x1b9   :  { %v374_v42 = vpack.c.bf16 %v268_v41, %v266_v40 }
 0x1bb   :  { %375 = vst [vmem:[%s516_s7] sm:$0xff] %v374_v42  }
 0x1bc   :  { %278 = vsyncpa [#allocation3], 1 }
 0x1bd   :  { %279 = vsyncpa [#allocation5], 1 }

</bundles_post_ra>
